<compile_context>
chip_gen: v6e
topology: v6e:2x2x1
jax: 0.10.0
libtpu: 0.0.40
codegen_flags: <defaults>
</compile_context>

<pallas_src>
import math
import functools

import jax
import jax.numpy as jnp
from jax.experimental import pallas as pl
from jax.experimental.pallas import tpu as pltpu

_HALF_LOG_2PI = 0.9189385332046727  # 0.5 * log(2*pi)


def _lgamma_ge1(x):
    """log-gamma for x >= 1: shift argument by 8, then Stirling series."""
    # Two partial products keep the shift in f32 range up to x ~ 1e9 while
    # replacing 8 EUP logs with 2 logs + 6 VPU multiplies.
    p0 = x * (x + 1.0) * (x + 2.0) * (x + 3.0)
    p1 = (x + 4.0) * (x + 5.0) * (x + 6.0) * (x + 7.0)
    z = x + 8.0
    zi = pl.reciprocal(z, approx=True)
    zi2 = zi * zi
    series = zi * (1.0 / 12.0 + zi2 * (-1.0 / 360.0 + zi2 * (1.0 / 1260.0)))
    return ((z - 0.5) * jnp.log(z) - z + _HALF_LOG_2PI + series
            - jnp.log(p0) - jnp.log(p1))


def _digamma_ge1(x):
    """digamma for x >= 1: shift argument by 5, then asymptotic series."""
    a0, a1, a2, a3, a4 = x, x + 1.0, x + 2.0, x + 3.0, x + 4.0
    p01 = a0 * a1
    p34 = a3 * a4
    # sum_{k=0..4} 1/(x+k) as one rational: a single division, rest on VPU.
    num = a2 * p34 * (a0 + a1) + p01 * (p34 + a2 * (a3 + a4))
    den = p01 * a2 * p34
    corr = num / den
    z = x + 5.0
    zi = pl.reciprocal(z, approx=True)
    zi2 = zi * zi
    tail = zi2 * (1.0 / 12.0 - zi2 * (1.0 / 120.0 - zi2 * (1.0 / 252.0)))
    return jnp.log(z) - 0.5 * zi - tail - corr


def _edl_kernel(pred_ref, esum_ref, tgt_ref, out_ref, *,
                lam, lgamma_k, k, n_true, tiles_per_par):
    cp = pl.program_id(0)   # parallel partition (megacore on v7x)
    i = pl.program_id(1)    # row-tile index within the partition

    @pl.when(i == 0)
    def _():
        out_ref[...] = jnp.zeros_like(out_ref)

    pred = pred_ref[...].astype(jnp.float32)        # (C, TN) class-major
    es_log = esum_ref[...].astype(jnp.float32)      # (1, TN)
    tgt = tgt_ref[...]                              # (1, TN) int32

    num_c, tile_n = pred.shape

    # one-hot mask built in-kernel (no (N, C) one-hot array in HBM)
    cls = jax.lax.broadcasted_iota(jnp.int32, (num_c, tile_n), 0)
    is_t = cls == tgt                               # (C, TN) bool

    # softmax over classes (sublane axis); all rows fully lane-dense
    m = jnp.max(pred, axis=0, keepdims=True)
    z = jnp.exp(pred - m)
    p = z * (1.0 / jnp.sum(z, axis=0, keepdims=True))

    e_sum = jnp.exp(es_log)                         # (1, TN)
    s = e_sum + k
    alpha = e_sum * p + 1.0                         # (C, TN)

    # cross-entropy-like term: only the target class survives the class sum,
    # so take a single log per row instead of C logs.
    alpha_t = jnp.sum(jnp.where(is_t, alpha, 0.0), axis=0, keepdims=True)
    ce = -jnp.log(alpha_t / s + 1e-05)              # (1, TN)

    # KL(Dir(alpha_hat) || Dir(1)) per row
    alpha_hat = jnp.where(is_t, 1.0, alpha)         # (C, TN)
    ah_sum = jnp.sum(alpha_hat, axis=0, keepdims=True)
    kl = (_lgamma_ge1(ah_sum) - lgamma_k
          - jnp.sum(_lgamma_ge1(alpha_hat), axis=0, keepdims=True)
          + jnp.sum((alpha_hat - 1.0)
                    * (_digamma_ge1(alpha_hat) - _digamma_ge1(ah_sum)),
                    axis=0, keepdims=True))
    kl_weight = 1.0 - 1.0 / (1.0 + kl)
    new_cl = kl_weight * jnp.log(e_sum + 1.0)       # (1, TN)

    # xcor term: target-class probability, single log per row
    p_t = jnp.sum(jnp.where(is_t, p, 0.0), axis=0, keepdims=True)
    xc = -jnp.log(p_t)

    per_col = 0.5 * ce + lam * new_cl + xc          # (1, TN)

    # mask padded rows so they contribute zero to the mean
    col = jax.lax.broadcasted_iota(jnp.int32, (1, tile_n), 1)
    gcol = (cp * tiles_per_par + i) * tile_n + col
    valid = (gcol < n_true).astype(jnp.float32)

    # lane-dense vector accumulation (final scalar reduce done in the wrapper)
    out_ref[0:1, :] += per_col * valid


def edl_loss_cl_pallas(pred, e_sum, target, *, lambdat=1.0, current_epoch=5,
                       loss_weight=1.0, tile_n=512):
    n, c = pred.shape
    lam = min(lambdat, lambdat * (current_epoch - 1) / 10.0)

    # Lane-dense row tiling: tile_n multiple of 128, clamped for small N.
    tile_n = max(128, min(int(tile_n), ((n + 127) // 128) * 128))
    tiles_total = -(-n // tile_n)
    n_par = 2 if tiles_total >= 2 else 1            # use both TCs on v7x
    tiles_per_par = -(-tiles_total // n_par)
    n_pad = n_par * tiles_per_par * tile_n

    # Class-major, row-padded layouts (layout plumbing only, not compute).
    pred_t = jnp.pad(pred.astype(jnp.float32).T, ((0, 0), (0, n_pad - n)))
    es_row = jnp.pad(e_sum.astype(jnp.float32).reshape(1, n),
                     ((0, 0), (0, n_pad - n)))
    tgt_row = jnp.pad(target.astype(jnp.int32).reshape(1, n),
                      ((0, 0), (0, n_pad - n)))

    kernel = functools.partial(
        _edl_kernel,
        lam=float(lam),
        lgamma_k=math.lgamma(float(c)),
        k=float(c),
        n_true=n,
        tiles_per_par=tiles_per_par,
    )

    partials = pl.pallas_call(
        kernel,
        out_shape=jax.ShapeDtypeStruct((8 * n_par, tile_n), jnp.float32),
        grid=(n_par, tiles_per_par),
        in_specs=[
            pl.BlockSpec((c, tile_n), lambda cp, i: (0, cp * tiles_per_par + i)),
            pl.BlockSpec((1, tile_n), lambda cp, i: (0, cp * tiles_per_par + i)),
            pl.BlockSpec((1, tile_n), lambda cp, i: (0, cp * tiles_per_par + i)),
        ],
        out_specs=pl.BlockSpec((8, tile_n), lambda cp, i: (cp, 0)),
        compiler_params=pltpu.CompilerParams(
            dimension_semantics=("parallel", "arbitrary")),
    )(pred_t, es_row, tgt_row)

    return loss_weight * jnp.sum(partials) / n


def _edl_loss_cl_ref(pred, e_sum, target, *, lambdat, current_epoch,
                     loss_weight):
    """Pure-JAX reference mirroring the PyTorch implementation."""
    from jax.scipy.special import gammaln, digamma
    c = pred.shape[-1]
    t = jax.nn.one_hot(target, c, dtype=jnp.float32)
    lam = min(lambdat, lambdat * (current_epoch - 1) / 10.0)
    p = jax.nn.softmax(pred, axis=1)
    es = jnp.exp(e_sum)
    s = es + c
    alpha = es * p + 1.0
    loss_ce = jnp.mean(jnp.sum(-t * jnp.log(alpha / s + 1e-05), axis=1)) * 0.5
    alpha_hat = t + (1.0 - t) * alpha
    ah_sum = jnp.sum(alpha_hat, axis=1, keepdims=True)
    kl = (gammaln(ah_sum) - gammaln(jnp.float32(c))
          - jnp.sum(gammaln(alpha_hat), axis=1, keepdims=True)
          + jnp.sum((alpha_hat - 1.0) * (digamma(alpha_hat) - digamma(ah_sum)),
                    axis=1, keepdims=True))
    kl_weight = 1.0 - 1.0 / (1.0 + kl)
    new_cl = kl_weight * jnp.log(es + 1.0)
    xcor = jnp.mean(-jnp.log(jnp.sum(t * p, axis=1, keepdims=True)))
    return loss_weight * (loss_ce + lam * jnp.mean(new_cl) + xcor)


if __name__ == "__main__":
    key = jax.random.PRNGKey(0)

    # Case 1: small shapes (single tile, single partition).
    k1, k2, k3 = jax.random.split(key, 3)
    N, C = 32, 16
    pred = jax.random.normal(k1, (N, C), dtype=jnp.float32)
    e_sum = 0.5 * jax.random.normal(k2, (N, 1), dtype=jnp.float32)
    target = jax.random.randint(k3, (N,), 0, C, dtype=jnp.int32)

    loss = edl_loss_cl_pallas(pred, e_sum, target, lambdat=1.0,
                              current_epoch=5, loss_weight=1.0)
    loss = jax.block_until_ready(loss)
    ref = _edl_loss_cl_ref(pred, e_sum, target, lambdat=1.0,
                           current_epoch=5, loss_weight=1.0)
    assert jnp.allclose(loss, ref, rtol=2e-3, atol=2e-3), (loss, ref)

    # Case 2: ragged N (exercises padding mask + parallel tile partition).
    k4, k5, k6 = jax.random.split(k3, 3)
    N2, C2 = 700, 16
    pred2 = jax.random.normal(k4, (N2, C2), dtype=jnp.float32)
    e_sum2 = 0.5 * jax.random.normal(k5, (N2, 1), dtype=jnp.float32)
    target2 = jax.random.randint(k6, (N2,), 0, C2, dtype=jnp.int32)

    loss2 = edl_loss_cl_pallas(pred2, e_sum2, target2, lambdat=1.0,
                               current_epoch=5, loss_weight=1.0, tile_n=512)
    loss2 = jax.block_until_ready(loss2)
    ref2 = _edl_loss_cl_ref(pred2, e_sum2, target2, lambdat=1.0,
                            current_epoch=5, loss_weight=1.0)
    assert jnp.allclose(loss2, ref2, rtol=2e-3, atol=2e-3), (loss2, ref2)

    print("KERNEL_OK")
</pallas_src>

<mosaic_0001>
module attributes {stable_mosaic.version = 11 : i64} {
  func.func @_edl_kernel(%arg0: i32, %arg1: i32, %arg2: memref<16x128xf32, #tpu.memory_space<vmem>>, %arg3: memref<1x128xf32, #tpu.memory_space<vmem>>, %arg4: memref<1x128xi32, #tpu.memory_space<vmem>>, %arg5: memref<8x128xf32, #tpu.memory_space<vmem>>) attributes {dimension_semantics = [#tpu.dimension_semantics<parallel>, #tpu.dimension_semantics<arbitrary>], iteration_bounds = array<i64: 1, 1>, scalar_prefetch = 0 : i64, scratch_operands = 0 : i64, tpu.core_type = #tpu.core_type<tc>, window_params = [{transform_indices = @transform_0, window_bounds = array<i64: 16, 128>}, {transform_indices = @transform_1, window_bounds = array<i64: 1, 128>}, {transform_indices = @transform_2, window_bounds = array<i64: 1, 128>}, {transform_indices = @transform_3, window_bounds = array<i64: 8, 128>}]} {
    %c0_i32 = arith.constant 0 : i32
    %0 = arith.cmpi eq, %arg1, %c0_i32 : i32
    %1 = arith.extui %0 : i1 to i32
    %c0_i32_0 = arith.constant 0 : i32
    %2 = arith.cmpi ne, %1, %c0_i32_0 : i32
    scf.if %2 {
      %cst_77 = arith.constant 0.000000e+00 : f32
      %257 = vector.broadcast %cst_77 : f32 to vector<8x128xf32>
      %c0_78 = arith.constant 0 : index
      %c0_79 = arith.constant 0 : index
      %258 = vector.load %arg5[%c0_78, %c0_79] : memref<8x128xf32, #tpu.memory_space<vmem>>, vector<8x128xf32>
      tpu.vector_store %arg5[%c0_78, %c0_79], %257 {strides = array<i32>} : memref<8x128xf32, #tpu.memory_space<vmem>>, vector<8x128xf32>,
    } else {
    }
    %c0 = arith.constant 0 : index
    %c0_1 = arith.constant 0 : index
    %3 = vector.load %arg2[%c0, %c0_1] : memref<16x128xf32, #tpu.memory_space<vmem>>, vector<16x128xf32>
    %c0_2 = arith.constant 0 : index
    %c0_3 = arith.constant 0 : index
    %4 = vector.load %arg3[%c0_2, %c0_3] : memref<1x128xf32, #tpu.memory_space<vmem>>, vector<1x128xf32>
    %c0_4 = arith.constant 0 : index
    %c0_5 = arith.constant 0 : index
    %5 = vector.load %arg4[%c0_4, %c0_5] : memref<1x128xi32, #tpu.memory_space<vmem>>, vector<1x128xi32>
    %6 = tpu.iota {dimensions = array<i32: 0>} : vector<16x128xi32>
    %7 = vector.broadcast %5 : vector<1x128xi32> to vector<16x128xi32>
    %8 = arith.cmpi eq, %6, %7 : vector<16x128xi32>
    %cst = arith.constant dense<0xFF800000> : vector<128xf32>
    %9 = vector.multi_reduction <maximumf>, %3, %cst [0] : vector<16x128xf32> to vector<128xf32>
    %10 = vector.shape_cast %9 : vector<128xf32> to vector<1x128xf32>
    %11 = vector.broadcast %10 : vector<1x128xf32> to vector<16x128xf32>
    %12 = arith.subf %3, %11 : vector<16x128xf32>
    %13 = math.exp %12 : vector<16x128xf32>
    %cst_6 = arith.constant dense<0.000000e+00> : vector<128xf32>
    %14 = vector.multi_reduction <add>, %13, %cst_6 [0] : vector<16x128xf32> to vector<128xf32>
    %15 = vector.shape_cast %14 : vector<128xf32> to vector<1x128xf32>
    %cst_7 = arith.constant 1.000000e+00 : f32
    %16 = vector.broadcast %cst_7 : f32 to vector<1x128xf32>
    %17 = arith.divf %16, %15 : vector<1x128xf32>
    %18 = vector.broadcast %17 : vector<1x128xf32> to vector<16x128xf32>
    %19 = arith.mulf %13, %18 : vector<16x128xf32>
    %20 = math.exp %4 : vector<1x128xf32>
    %cst_8 = arith.constant 1.600000e+01 : f32
    %21 = vector.broadcast %cst_8 : f32 to vector<1x128xf32>
    %22 = arith.addf %20, %21 : vector<1x128xf32>
    %23 = vector.broadcast %20 : vector<1x128xf32> to vector<16x128xf32>
    %24 = arith.mulf %23, %19 : vector<16x128xf32>
    %cst_9 = arith.constant 1.000000e+00 : f32
    %25 = vector.broadcast %cst_9 : f32 to vector<16x128xf32>
    %26 = arith.addf %24, %25 : vector<16x128xf32>
    %cst_10 = arith.constant 0.000000e+00 : f32
    %27 = vector.broadcast %cst_10 : f32 to vector<16x128xf32>
    %28 = arith.select %8, %26, %27 : vector<16x128xi1>, vector<16x128xf32>
    %cst_11 = arith.constant dense<0.000000e+00> : vector<128xf32>
    %29 = vector.multi_reduction <add>, %28, %cst_11 [0] : vector<16x128xf32> to vector<128xf32>
    %30 = vector.shape_cast %29 : vector<128xf32> to vector<1x128xf32>
    %31 = arith.divf %30, %22 : vector<1x128xf32>
    %cst_12 = arith.constant 9.99999974E-6 : f32
    %32 = vector.broadcast %cst_12 : f32 to vector<1x128xf32>
    %33 = arith.addf %31, %32 : vector<1x128xf32>
    %34 = math.log %33 : vector<1x128xf32>
    %cst_13 = arith.constant 0.000000e+00 : f32
    %35 = vector.broadcast %cst_13 : f32 to vector<1x128xf32>
    %36 = arith.subf %35, %34 : vector<1x128xf32>
    %cst_14 = arith.constant 1.000000e+00 : f32
    %37 = vector.broadcast %cst_14 : f32 to vector<16x128xf32>
    %38 = arith.select %8, %37, %26 : vector<16x128xi1>, vector<16x128xf32>
    %cst_15 = arith.constant dense<0.000000e+00> : vector<128xf32>
    %39 = vector.multi_reduction <add>, %38, %cst_15 [0] : vector<16x128xf32> to vector<128xf32>
    %40 = vector.shape_cast %39 : vector<128xf32> to vector<1x128xf32>
    %cst_16 = arith.constant 1.000000e+00 : f32
    %41 = vector.broadcast %cst_16 : f32 to vector<1x128xf32>
    %42 = arith.addf %40, %41 : vector<1x128xf32>
    %43 = arith.mulf %40, %42 : vector<1x128xf32>
    %cst_17 = arith.constant 2.000000e+00 : f32
    %44 = vector.broadcast %cst_17 : f32 to vector<1x128xf32>
    %45 = arith.addf %40, %44 : vector<1x128xf32>
    %46 = arith.mulf %43, %45 : vector<1x128xf32>
    %cst_18 = arith.constant 3.000000e+00 : f32
    %47 = vector.broadcast %cst_18 : f32 to vector<1x128xf32>
    %48 = arith.addf %40, %47 : vector<1x128xf32>
    %49 = arith.mulf %46, %48 : vector<1x128xf32>
    %cst_19 = arith.constant 4.000000e+00 : f32
    %50 = vector.broadcast %cst_19 : f32 to vector<1x128xf32>
    %51 = arith.addf %40, %50 : vector<1x128xf32>
    %cst_20 = arith.constant 5.000000e+00 : f32
    %52 = vector.broadcast %cst_20 : f32 to vector<1x128xf32>
    %53 = arith.addf %40, %52 : vector<1x128xf32>
    %54 = arith.mulf %51, %53 : vector<1x128xf32>
    %cst_21 = arith.constant 6.000000e+00 : f32
    %55 = vector.broadcast %cst_21 : f32 to vector<1x128xf32>
    %56 = arith.addf %40, %55 : vector<1x128xf32>
    %57 = arith.mulf %54, %56 : vector<1x128xf32>
    %cst_22 = arith.constant 7.000000e+00 : f32
    %58 = vector.broadcast %cst_22 : f32 to vector<1x128xf32>
    %59 = arith.addf %40, %58 : vector<1x128xf32>
    %60 = arith.mulf %57, %59 : vector<1x128xf32>
    %cst_23 = arith.constant 8.000000e+00 : f32
    %61 = vector.broadcast %cst_23 : f32 to vector<1x128xf32>
    %62 = arith.addf %40, %61 : vector<1x128xf32>
    %63 = tpu.reciprocal %62 {approx = true} : vector<1x128xf32> -> vector<1x128xf32>
    %64 = arith.mulf %63, %63 : vector<1x128xf32>
    %cst_24 = arith.constant 7.93650805E-4 : f32
    %65 = vector.broadcast %cst_24 : f32 to vector<1x128xf32>
    %66 = arith.mulf %64, %65 : vector<1x128xf32>
    %cst_25 = arith.constant -0.00277777785 : f32
    %67 = vector.broadcast %cst_25 : f32 to vector<1x128xf32>
    %68 = arith.addf %67, %66 : vector<1x128xf32>
    %69 = arith.mulf %64, %68 : vector<1x128xf32>
    %cst_26 = arith.constant 0.0833333358 : f32
    %70 = vector.broadcast %cst_26 : f32 to vector<1x128xf32>
    %71 = arith.addf %70, %69 : vector<1x128xf32>
    %72 = arith.mulf %63, %71 : vector<1x128xf32>
    %cst_27 = arith.constant 5.000000e-01 : f32
    %73 = vector.broadcast %cst_27 : f32 to vector<1x128xf32>
    %74 = arith.subf %62, %73 : vector<1x128xf32>
    %75 = math.log %62 : vector<1x128xf32>
    %76 = arith.mulf %74, %75 : vector<1x128xf32>
    %77 = arith.subf %76, %62 : vector<1x128xf32>
    %cst_28 = arith.constant 0.918938517 : f32
    %78 = vector.broadcast %cst_28 : f32 to vector<1x128xf32>
    %79 = arith.addf %77, %78 : vector<1x128xf32>
    %80 = arith.addf %79, %72 : vector<1x128xf32>
    %81 = math.log %49 : vector<1x128xf32>
    %82 = arith.subf %80, %81 : vector<1x128xf32>
    %83 = math.log %60 : vector<1x128xf32>
    %84 = arith.subf %82, %83 : vector<1x128xf32>
    %cst_29 = arith.constant 27.899271 : f32
    %85 = vector.broadcast %cst_29 : f32 to vector<1x128xf32>
    %86 = arith.subf %84, %85 : vector<1x128xf32>
    %cst_30 = arith.constant 1.000000e+00 : f32
    %87 = vector.broadcast %cst_30 : f32 to vector<16x128xf32>
    %88 = arith.addf %38, %87 : vector<16x128xf32>
    %89 = arith.mulf %38, %88 : vector<16x128xf32>
    %cst_31 = arith.constant 2.000000e+00 : f32
    %90 = vector.broadcast %cst_31 : f32 to vector<16x128xf32>
    %91 = arith.addf %38, %90 : vector<16x128xf32>
    %92 = arith.mulf %89, %91 : vector<16x128xf32>
    %cst_32 = arith.constant 3.000000e+00 : f32
    %93 = vector.broadcast %cst_32 : f32 to vector<16x128xf32>
    %94 = arith.addf %38, %93 : vector<16x128xf32>
    %95 = arith.mulf %92, %94 : vector<16x128xf32>
    %cst_33 = arith.constant 4.000000e+00 : f32
    %96 = vector.broadcast %cst_33 : f32 to vector<16x128xf32>
    %97 = arith.addf %38, %96 : vector<16x128xf32>
    %cst_34 = arith.constant 5.000000e+00 : f32
    %98 = vector.broadcast %cst_34 : f32 to vector<16x128xf32>
    %99 = arith.addf %38, %98 : vector<16x128xf32>
    %100 = arith.mulf %97, %99 : vector<16x128xf32>
    %cst_35 = arith.constant 6.000000e+00 : f32
    %101 = vector.broadcast %cst_35 : f32 to vector<16x128xf32>
    %102 = arith.addf %38, %101 : vector<16x128xf32>
    %103 = arith.mulf %100, %102 : vector<16x128xf32>
    %cst_36 = arith.constant 7.000000e+00 : f32
    %104 = vector.broadcast %cst_36 : f32 to vector<16x128xf32>
    %105 = arith.addf %38, %104 : vector<16x128xf32>
    %106 = arith.mulf %103, %105 : vector<16x128xf32>
    %cst_37 = arith.constant 8.000000e+00 : f32
    %107 = vector.broadcast %cst_37 : f32 to vector<16x128xf32>
    %108 = arith.addf %38, %107 : vector<16x128xf32>
    %109 = tpu.reciprocal %108 {approx = true} : vector<16x128xf32> -> vector<16x128xf32>
    %110 = arith.mulf %109, %109 : vector<16x128xf32>
    %cst_38 = arith.constant 7.93650805E-4 : f32
    %111 = vector.broadcast %cst_38 : f32 to vector<16x128xf32>
    %112 = arith.mulf %110, %111 : vector<16x128xf32>
    %cst_39 = arith.constant -0.00277777785 : f32
    %113 = vector.broadcast %cst_39 : f32 to vector<16x128xf32>
    %114 = arith.addf %113, %112 : vector<16x128xf32>
    %115 = arith.mulf %110, %114 : vector<16x128xf32>
    %cst_40 = arith.constant 0.0833333358 : f32
    %116 = vector.broadcast %cst_40 : f32 to vector<16x128xf32>
    %117 = arith.addf %116, %115 : vector<16x128xf32>
    %118 = arith.mulf %109, %117 : vector<16x128xf32>
    %cst_41 = arith.constant 5.000000e-01 : f32
    %119 = vector.broadcast %cst_41 : f32 to vector<16x128xf32>
    %120 = arith.subf %108, %119 : vector<16x128xf32>
    %121 = math.log %108 : vector<16x128xf32>
    %122 = arith.mulf %120, %121 : vector<16x128xf32>
    %123 = arith.subf %122, %108 : vector<16x128xf32>
    %cst_42 = arith.constant 0.918938517 : f32
    %124 = vector.broadcast %cst_42 : f32 to vector<16x128xf32>
    %125 = arith.addf %123, %124 : vector<16x128xf32>
    %126 = arith.addf %125, %118 : vector<16x128xf32>
    %127 = math.log %95 : vector<16x128xf32>
    %128 = arith.subf %126, %127 : vector<16x128xf32>
    %129 = math.log %106 : vector<16x128xf32>
    %130 = arith.subf %128, %129 : vector<16x128xf32>
    %cst_43 = arith.constant dense<0.000000e+00> : vector<128xf32>
    %131 = vector.multi_reduction <add>, %130, %cst_43 [0] : vector<16x128xf32> to vector<128xf32>
    %132 = vector.shape_cast %131 : vector<128xf32> to vector<1x128xf32>
    %133 = arith.subf %86, %132 : vector<1x128xf32>
    %cst_44 = arith.constant 1.000000e+00 : f32
    %134 = vector.broadcast %cst_44 : f32 to vector<16x128xf32>
    %135 = arith.subf %38, %134 : vector<16x128xf32>
    %cst_45 = arith.constant 1.000000e+00 : f32
    %136 = vector.broadcast %cst_45 : f32 to vector<16x128xf32>
    %137 = arith.addf %38, %136 : vector<16x128xf32>
    %cst_46 = arith.constant 2.000000e+00 : f32
    %138 = vector.broadcast %cst_46 : f32 to vector<16x128xf32>
    %139 = arith.addf %38, %138 : vector<16x128xf32>
    %cst_47 = arith.constant 3.000000e+00 : f32
    %140 = vector.broadcast %cst_47 : f32 to vector<16x128xf32>
    %141 = arith.addf %38, %140 : vector<16x128xf32>
    %cst_48 = arith.constant 4.000000e+00 : f32
    %142 = vector.broadcast %cst_48 : f32 to vector<16x128xf32>
    %143 = arith.addf %38, %142 : vector<16x128xf32>
    %144 = arith.mulf %38, %137 : vector<16x128xf32>
    %145 = arith.mulf %141, %143 : vector<16x128xf32>
    %146 = arith.mulf %139, %145 : vector<16x128xf32>
    %147 = arith.addf %38, %137 : vector<16x128xf32>
    %148 = arith.mulf %146, %147 : vector<16x128xf32>
    %149 = arith.addf %141, %143 : vector<16x128xf32>
    %150 = arith.mulf %139, %149 : vector<16x128xf32>
    %151 = arith.addf %145, %150 : vector<16x128xf32>
    %152 = arith.mulf %144, %151 : vector<16x128xf32>
    %153 = arith.addf %148, %152 : vector<16x128xf32>
    %154 = arith.mulf %144, %139 : vector<16x128xf32>
    %155 = arith.mulf %154, %145 : vector<16x128xf32>
    %156 = arith.divf %153, %155 : vector<16x128xf32>
    %cst_49 = arith.constant 5.000000e+00 : f32
    %157 = vector.broadcast %cst_49 : f32 to vector<16x128xf32>
    %158 = arith.addf %38, %157 : vector<16x128xf32>
    %159 = tpu.reciprocal %158 {approx = true} : vector<16x128xf32> -> vector<16x128xf32>
    %160 = arith.mulf %159, %159 : vector<16x128xf32>
    %cst_50 = arith.constant 0.0039682542 : f32
    %161 = vector.broadcast %cst_50 : f32 to vector<16x128xf32>
    %162 = arith.mulf %160, %161 : vector<16x128xf32>
    %cst_51 = arith.constant 0.00833333377 : f32
    %163 = vector.broadcast %cst_51 : f32 to vector<16x128xf32>
    %164 = arith.subf %163, %162 : vector<16x128xf32>
    %165 = arith.mulf %160, %164 : vector<16x128xf32>
    %cst_52 = arith.constant 0.0833333358 : f32
    %166 = vector.broadcast %cst_52 : f32 to vector<16x128xf32>
    %167 = arith.subf %166, %165 : vector<16x128xf32>
    %168 = arith.mulf %160, %167 : vector<16x128xf32>
    %169 = math.log %158 : vector<16x128xf32>
    %cst_53 = arith.constant 5.000000e-01 : f32
    %170 = vector.broadcast %cst_53 : f32 to vector<16x128xf32>
    %171 = arith.mulf %170, %159 : vector<16x128xf32>
    %172 = arith.subf %169, %171 : vector<16x128xf32>
    %173 = arith.subf %172, %168 : vector<16x128xf32>
    %174 = arith.subf %173, %156 : vector<16x128xf32>
    %cst_54 = arith.constant 1.000000e+00 : f32
    %175 = vector.broadcast %cst_54 : f32 to vector<1x128xf32>
    %176 = arith.addf %40, %175 : vector<1x128xf32>
    %cst_55 = arith.constant 2.000000e+00 : f32
    %177 = vector.broadcast %cst_55 : f32 to vector<1x128xf32>
    %178 = arith.addf %40, %177 : vector<1x128xf32>
    %cst_56 = arith.constant 3.000000e+00 : f32
    %179 = vector.broadcast %cst_56 : f32 to vector<1x128xf32>
    %180 = arith.addf %40, %179 : vector<1x128xf32>
    %cst_57 = arith.constant 4.000000e+00 : f32
    %181 = vector.broadcast %cst_57 : f32 to vector<1x128xf32>
    %182 = arith.addf %40, %181 : vector<1x128xf32>
    %183 = arith.mulf %40, %176 : vector<1x128xf32>
    %184 = arith.mulf %180, %182 : vector<1x128xf32>
    %185 = arith.mulf %178, %184 : vector<1x128xf32>
    %186 = arith.addf %40, %176 : vector<1x128xf32>
    %187 = arith.mulf %185, %186 : vector<1x128xf32>
    %188 = arith.addf %180, %182 : vector<1x128xf32>
    %189 = arith.mulf %178, %188 : vector<1x128xf32>
    %190 = arith.addf %184, %189 : vector<1x128xf32>
    %191 = arith.mulf %183, %190 : vector<1x128xf32>
    %192 = arith.addf %187, %191 : vector<1x128xf32>
    %193 = arith.mulf %183, %178 : vector<1x128xf32>
    %194 = arith.mulf %193, %184 : vector<1x128xf32>
    %195 = arith.divf %192, %194 : vector<1x128xf32>
    %cst_58 = arith.constant 5.000000e+00 : f32
    %196 = vector.broadcast %cst_58 : f32 to vector<1x128xf32>
    %197 = arith.addf %40, %196 : vector<1x128xf32>
    %198 = tpu.reciprocal %197 {approx = true} : vector<1x128xf32> -> vector<1x128xf32>
    %199 = arith.mulf %198, %198 : vector<1x128xf32>
    %cst_59 = arith.constant 0.0039682542 : f32
    %200 = vector.broadcast %cst_59 : f32 to vector<1x128xf32>
    %201 = arith.mulf %199, %200 : vector<1x128xf32>
    %cst_60 = arith.constant 0.00833333377 : f32
    %202 = vector.broadcast %cst_60 : f32 to vector<1x128xf32>
    %203 = arith.subf %202, %201 : vector<1x128xf32>
    %204 = arith.mulf %199, %203 : vector<1x128xf32>
    %cst_61 = arith.constant 0.0833333358 : f32
    %205 = vector.broadcast %cst_61 : f32 to vector<1x128xf32>
    %206 = arith.subf %205, %204 : vector<1x128xf32>
    %207 = arith.mulf %199, %206 : vector<1x128xf32>
    %208 = math.log %197 : vector<1x128xf32>
    %cst_62 = arith.constant 5.000000e-01 : f32
    %209 = vector.broadcast %cst_62 : f32 to vector<1x128xf32>
    %210 = arith.mulf %209, %198 : vector<1x128xf32>
    %211 = arith.subf %208, %210 : vector<1x128xf32>
    %212 = arith.subf %211, %207 : vector<1x128xf32>
    %213 = arith.subf %212, %195 : vector<1x128xf32>
    %214 = vector.broadcast %213 : vector<1x128xf32> to vector<16x128xf32>
    %215 = arith.subf %174, %214 : vector<16x128xf32>
    %216 = arith.mulf %135, %215 : vector<16x128xf32>
    %cst_63 = arith.constant dense<0.000000e+00> : vector<128xf32>
    %217 = vector.multi_reduction <add>, %216, %cst_63 [0] : vector<16x128xf32> to vector<128xf32>
    %218 = vector.shape_cast %217 : vector<128xf32> to vector<1x128xf32>
    %219 = arith.addf %133, %218 : vector<1x128xf32>
    %cst_64 = arith.constant 1.000000e+00 : f32
    %220 = vector.broadcast %cst_64 : f32 to vector<1x128xf32>
    %221 = arith.addf %220, %219 : vector<1x128xf32>
    %cst_65 = arith.constant 1.000000e+00 : f32
    %222 = vector.broadcast %cst_65 : f32 to vector<1x128xf32>
    %223 = arith.divf %222, %221 : vector<1x128xf32>
    %cst_66 = arith.constant 1.000000e+00 : f32
    %224 = vector.broadcast %cst_66 : f32 to vector<1x128xf32>
    %225 = arith.subf %224, %223 : vector<1x128xf32>
    %cst_67 = arith.constant 1.000000e+00 : f32
    %226 = vector.broadcast %cst_67 : f32 to vector<1x128xf32>
    %227 = arith.addf %20, %226 : vector<1x128xf32>
    %228 = math.log %227 : vector<1x128xf32>
    %229 = arith.mulf %225, %228 : vector<1x128xf32>
    %cst_68 = arith.constant 0.000000e+00 : f32
    %230 = vector.broadcast %cst_68 : f32 to vector<16x128xf32>
    %231 = arith.select %8, %19, %230 : vector<16x128xi1>, vector<16x128xf32>
    %cst_69 = arith.constant dense<0.000000e+00> : vector<128xf32>
    %232 = vector.multi_reduction <add>, %231, %cst_69 [0] : vector<16x128xf32> to vector<128xf32>
    %233 = vector.shape_cast %232 : vector<128xf32> to vector<1x128xf32>
    %234 = math.log %233 : vector<1x128xf32>
    %cst_70 = arith.constant 0.000000e+00 : f32
    %235 = vector.broadcast %cst_70 : f32 to vector<1x128xf32>
    %236 = arith.subf %235, %234 : vector<1x128xf32>
    %cst_71 = arith.constant 5.000000e-01 : f32
    %237 = vector.broadcast %cst_71 : f32 to vector<1x128xf32>
    %238 = arith.mulf %237, %36 : vector<1x128xf32>
    %cst_72 = arith.constant 4.000000e-01 : f32
    %239 = vector.broadcast %cst_72 : f32 to vector<1x128xf32>
    %240 = arith.mulf %239, %229 : vector<1x128xf32>
    %241 = arith.addf %238, %240 : vector<1x128xf32>
    %242 = arith.addf %241, %236 : vector<1x128xf32>
    %243 = tpu.iota {dimensions = array<i32: 1>} : vector<1x128xi32>
    %c1_i32 = arith.constant 1 : i32
    %244 = arith.muli %arg0, %c1_i32 : i32
    %245 = arith.addi %244, %arg1 : i32
    %c128_i32 = arith.constant 128 : i32
    %246 = arith.muli %245, %c128_i32 : i32
    %247 = vector.broadcast %246 : i32 to vector<1x128xi32>
    %248 = arith.addi %247, %243 : vector<1x128xi32>
    %c32_i32 = arith.constant 32 : i32
    %249 = vector.broadcast %c32_i32 : i32 to vector<1x128xi32>
    %250 = arith.cmpi slt, %248, %249 : vector<1x128xi32>
    %251 = arith.extui %250 : vector<1x128xi1> to vector<1x128xi32>
    %252 = arith.sitofp %251 : vector<1x128xi32> to vector<1x128xf32>
    %c0_73 = arith.constant 0 : index
    %c0_74 = arith.constant 0 : index
    %253 = vector.load %arg5[%c0_73, %c0_74] : memref<8x128xf32, #tpu.memory_space<vmem>>, vector<1x128xf32>
    %254 = arith.mulf %242, %252 : vector<1x128xf32>
    %255 = arith.addf %253, %254 : vector<1x128xf32>
    %c0_75 = arith.constant 0 : index
    %c0_76 = arith.constant 0 : index
    %256 = vector.load %arg5[%c0_75, %c0_76] : memref<8x128xf32, #tpu.memory_space<vmem>>, vector<1x128xf32>
    tpu.vector_store %arg5[%c0_75, %c0_76], %255 {strides = array<i32>} : memref<8x128xf32, #tpu.memory_space<vmem>>, vector<1x128xf32>,
    return
  }
  func.func @transform_0(%arg0: i32, %arg1: i32) -> (i32, i32) {
    %c1_i32 = arith.constant 1 : i32
    %0 = arith.muli %arg0, %c1_i32 : i32
    %1 = arith.addi %0, %arg1 : i32
    %c0_i32 = arith.constant 0 : i32
    %c0_i32_0 = arith.constant 0 : i32
    return %c0_i32, %1 : i32, i32
  }
  func.func @transform_1(%arg0: i32, %arg1: i32) -> (i32, i32) {
    %c1_i32 = arith.constant 1 : i32
    %0 = arith.muli %arg0, %c1_i32 : i32
    %1 = arith.addi %0, %arg1 : i32
    %c0_i32 = arith.constant 0 : i32
    %c0_i32_0 = arith.constant 0 : i32
    return %c0_i32, %1 : i32, i32
  }
  func.func @transform_2(%arg0: i32, %arg1: i32) -> (i32, i32) {
    %c1_i32 = arith.constant 1 : i32
    %0 = arith.muli %arg0, %c1_i32 : i32
    %1 = arith.addi %0, %arg1 : i32
    %c0_i32 = arith.constant 0 : i32
    %c0_i32_0 = arith.constant 0 : i32
    return %c0_i32, %1 : i32, i32
  }
  func.func @transform_3(%arg0: i32, %arg1: i32) -> (i32, i32) {
    %c0_i32 = arith.constant 0 : i32
    %c0_i32_0 = arith.constant 0 : i32
    return %arg0, %c0_i32 : i32, i32
  }
}

</mosaic_0001>

<bundles_post_ra>
// kernel: tpu_custom_call.1
= control target key start
LH: loop header
LB: loop body
LE: loop exit
PB: predicated region body
PF: predicated region fallthrough
CT: control target
= control target key end

     0   :  { %8 = vsyncpa [#allocation3], 0  ;;  %s729_s0 = inlined_call_operand.hbm [shape: f32[16,128], index: 0, kind: input, shape index: {}]   ;;  %s730_s1 = inlined_call_operand.vmem [shape: f32[1,128], index: 1, kind: input, shape index: {}]   ;;  %s731_s2 = inlined_call_operand.vmem [shape: s32[1,128], index: 2, kind: input, shape index: {}]   ;;  %s732_s3 = inlined_call_operand.hbm [shape: f32[8,128], index: 3, kind: output, shape index: {}]  }
   0x1   :  { %9 = vsyncpa [#allocation4], 0  ;;  %s515_s12 = smov [#allocation2]  }
   0x2   :  { %s18_s13 = sshll.u32 %s515_s12, 4  ;;  %s19_s13 = int_to_ptr.vmem [resolvable:$true] %s18_s13 }
   0x3   :  { %s479_s14 = scalar_lea.vmem %s19_s13, 256  ;;  %p484_p1 = scmp.lt.s32.totalorder %s19_s13, %s19_s13 }
   0x4   :  { %p480_p0 = scmp.ne.s32.totalorder %s19_s13, %s479_s14  ;;  %p485_p2 = scmp.lt.s32.totalorder %s479_s14, %s479_s14 }
   0x6   :  { %p486_p3 = por %p485_p2, %p484_p1 }
   0x8   :  { %p487_p4 = pnand %p486_p3, %p480_p0 }
   0xa   :  { %490 = shalt.err (!%p487_p4)
}
   0xb   :  { %s516_s15 = smov 128   ;;  %s517_s16 = smov 8  }
   0xc   :  { %24 = dma.hbm_to_vmem [thread:$0]  %s729_s0, 256, %s19_s13, [#allocation3], %s516_s15, %s516_s15, %s517_s16  }
   0xd   :  { %511 = dma.done.wait [#allocation3], 256  }
   0xe   :  { %512 = vsyncadd [#allocation3], 4294967040  ;;  %v518_v0 = vmov 0.0   ;;  %v66_v1 = vld [vmem:[#allocation2] sm:$0xff]  ;;  %v67_v2 = vld [vmem:[#allocation2 + $0x8] sm:$0xff]  ;;  %v70_v24 = vlaneseq }
   0xf   :  { %65 = vst [vmem:[#allocation5] sm:$0xff] %v518_v0  ;;  %v79_v3 = vmax.f32 %v66_v1, %v67_v2  ;;  %v68_v18 = vld [vmem:[%s730_s1] sm:$0x1] }
  0x10   :  { %v103_v21 = vmul.f32 1.442695, %v68_v18  ;;  %v365_v26 = vand.u32 127, %v70_v24  ;;  %v548_v28 = vshrl.u32 %v70_v24, 7  ;;  %v398_v34 = vld [vmem:[%s731_s2] ss:$0 sm:$0xff] }
  0x11   :  { %v80_v4 = vrot.slane %v79_v3, 4  ;;  %s519_s2 = smov [#allocation5]  }
  0x12   :  { %vm370_vm0 = vcmp.lt.s32.totalorder %v365_v26, 32  ;;  %v109_v29 = vsub.s32 0, %v548_v28  ;;  %v72_v33 = vadd.s32 8, %v548_v28  ;;  %vm77_vm1 = vcmp.eq.s32.totalorder %v548_v28, %v398_v34  ;;  %s383_s21 = sshll.u32 %s519_s2, 4  ;;  %s384_s21 = int_to_ptr.vmem [resolvable:$true] %s383_s21 }
  0x13   :  { %v81_v5 = vmax.f32 %v79_v3, %v80_v4  ;;  %v546_v27 = vsel %vm370_vm0, 1.0, %v518_v0  ;;  %s491_s22 = scalar_lea.vmem %s384_s21, 128  ;;  %p496_p6 = scmp.lt.s32.totalorder %s384_s21, %s384_s21 }
  0x14   :  { %vm78_vm2 = vcmp.eq.s32.totalorder %v72_v33, %v398_v34  ;;  %p492_p5 = scmp.ne.s32.totalorder %s384_s21, %s491_s22  ;;  %p497_p7 = scmp.lt.s32.totalorder %s491_s22, %s491_s22 }
  0x15   :  { %v82_v6 = vrot.slane %v81_v5, 2 }
  0x16   :  { %p498_p8 = por %p497_p7, %p496_p6 }
  0x17   :  { %v83_v7 = vmax.f32 %v81_v5, %v82_v6 }
  0x18   :  { %p499_p9 = pnand %p498_p8, %p492_p5 }
  0x19   :  { %v84_v8 = vrot.slane %v83_v7, 1 }
  0x1b   :  { %v85_v9 = vmax.f32 %v83_v7, %v84_v8 }
  0x1d   :  { %v86_v10 = vsub.f32 %v66_v1, %v85_v9  ;;  %v87_v11 = vsub.f32 %v67_v2, %v85_v9 }
  0x1f   :  { %v88_v12 = vmul.f32 1.442695, %v86_v10  ;;  %v90_v13 = vmul.f32 1.442695, %v87_v11 }
  0x21   :  { %411 = vpow2.f32 %v88_v12 }
  0x22   :  { %413 = vpow2.f32 %v90_v13 }
  0x23   :  { %415 = vpow2.f32 %v103_v21 }
  0x2e   :  { %v412_v14 = vpop.eup %411 }
  0x2f   :  { %v414_v15 = vpop.eup %413 }
  0x30   :  { %v92_v16 = vadd.f32 %v414_v15, %v412_v14  ;;  %v551_v30 = vpop.eup %415 }
  0x31   :  { %v110_v31 = vrot.slane %v551_v30, %v109_v29 }
  0x32   :  { %v93_v17 = vrot.slane %v92_v16, 4 }
  0x34   :  { %v94_v19 = vadd.f32 %v93_v17, %v92_v16  ;;  %v638_v17 = vadd.f32 16.0, %v551_v30 }
  0x36   :  { %v95_v20 = vrot.slane %v94_v19, 2 }
  0x38   :  { %v96_v22 = vadd.f32 %v95_v20, %v94_v19 }
  0x3a   :  { %v97_v23 = vrot.slane %v96_v22, 1 }
  0x3c   :  { %v98_v25 = vadd.f32 %v97_v23, %v96_v22 }
  0x3e   :  { %417 = vrcp.f32 %v98_v25 }
  0x4b   :  { %v418_v32 = vpop.eup %417 }
  0x4c   :  { %v101_v35 = vmul.f32 %v418_v32, %v412_v14  ;;  %v102_v36 = vmul.f32 %v418_v32, %v414_v15 }
  0x4e   :  { %v112_v37 = vmul.f32 %v110_v31, %v101_v35  ;;  %v113_v38 = vmul.f32 %v110_v31, %v102_v36  ;;  %v647_v20 = vsel %vm77_vm1, %v101_v35, 0.0  ;;  %v650_v21 = vsel %vm78_vm2, %v102_v36, 0.0 }
  0x50   :  { %v114_v39 = vadd.f32 1.0, %v112_v37  ;;  %v115_v40 = vadd.f32 1.0, %v113_v38 }
  0x52   :  { %v561_v41 = vsel %vm77_vm1, 1.0, %v114_v39  ;;  %v564_v42 = vsel %vm78_vm2, 1.0, %v115_v40  ;;  %v116_v4 = vsel %vm77_vm1, %v114_v39, 0.0  ;;  %v117_v5 = vsel %vm78_vm2, %v115_v40, 0.0 }
  0x53   :  { %v133_v43 = vadd.f32 %v564_v42, %v561_v41  ;;  %v175_v45 = vadd.f32 1.0, %v561_v41  ;;  %v176_v48 = vadd.f32 1.0, %v564_v42  ;;  %v574_v50 = vadd.f32 2.0, %v561_v41 }
  0x54   :  { %v577_v52 = vadd.f32 4.0, %v561_v41  ;;  %v580_v53 = vadd.f32 8.0, %v561_v41  ;;  %v583_v54 = vadd.f32 8.0, %v564_v42  ;;  %v586_v55 = vadd.f32 4.0, %v564_v42 }
  0x55   :  { %v134_v44 = vrot.slane %v133_v43, 4  ;;  %v571_v49 = vmul.f32 %v175_v45, %v561_v41  ;;  %v589_v56 = vmul.f32 %v176_v48, %v564_v42  ;;  %v592_v57 = vadd.f32 2.0, %v564_v42 }
  0x56   :  { %v595_v58 = vadd.f32 5.0, %v561_v41  ;;  %419 = vrcp.f32 %v580_v53  ;;  %v599_v60 = vadd.f32 5.0, %v564_v42  ;;  %v193_v63 = vadd.f32 6.0, %v561_v41 }
  0x57   :  { %v135_v46 = vadd.f32 %v134_v44, %v133_v43  ;;  %421 = vrcp.f32 %v583_v54  ;;  %v604_v61 = vmul.f32 %v574_v50, %v571_v49  ;;  %v194_v1 = vadd.f32 6.0, %v564_v42 }
  0x58   :  { %v191_v62 = vmul.f32 %v595_v58, %v577_v52  ;;  %423 = vlog2.f32 %v580_v53  ;;  %v192_v0 = vmul.f32 %v599_v60, %v586_v55  ;;  %v616_v2 = vmul.f32 %v592_v57, %v589_v56 }
  0x59   :  { %v136_v47 = vrot.slane %v135_v46, 2  ;;  %425 = vlog2.f32 %v583_v54  ;;  %v619_v3 = vadd.f32 3.0, %v561_v41  ;;  %v184_v7 = vadd.f32 3.0, %v564_v42 }
  0x5a   :  { %v195_v9 = vmul.f32 %v193_v63, %v191_v62  ;;  %v197_v10 = vadd.f32 7.0, %v561_v41  ;;  %v196_v12 = vmul.f32 %v194_v1, %v192_v0  ;;  %v198_v13 = vadd.f32 7.0, %v564_v42 }
  0x5b   :  { %v137_v51 = vadd.f32 %v136_v47, %v135_v46  ;;  %v185_v8 = vmul.f32 %v619_v3, %v604_v61  ;;  %v186_v14 = vmul.f32 %v184_v7, %v616_v2  ;;  %v635_v15 = vadd.f32 %v117_v5, %v116_v4 }
  0x5c   :  { %v199_v16 = vmul.f32 %v197_v10, %v195_v9  ;;  %v200_v18 = vmul.f32 %v198_v13, %v196_v12  ;;  %v643_v19 = vmul.f32 %v577_v52, %v619_v3  ;;  %v401_v24 = vadd.f32 -0.5, %v580_v53 }
  0x5d   :  { %v138_v59 = vrot.slane %v137_v51, 1  ;;  %427 = vlog2.f32 %v185_v8  ;;  %v119_v23 = vrot.slane %v635_v15, 4  ;;  %v402_v25 = vadd.f32 -0.5, %v583_v54 }
  0x5e   :  { %v656_v26 = vmul.f32 %v586_v55, %v184_v7  ;;  %v255_v28 = vmul.f32 %v643_v19, %v574_v50  ;;  %v257_v32 = vadd.f32 %v175_v45, %v561_v41  ;;  %v258_v36 = vadd.f32 %v176_v48, %v564_v42 }
  0x5f   :  { %v624_v6 = vadd.f32 %v138_v59, %v137_v51  ;;  %v261_v13 = vadd.f32 %v577_v52, %v619_v3 }
  0x60   :  { %v256_v52 = vmul.f32 %v656_v26, %v592_v57  ;;  %v272_v3 = vmul.f32 %v656_v26, %v616_v2 }
  0x61   :  { %v631_v11 = vadd.f32 8.0, %v624_v6  ;;  %v662_v34 = vadd.f32 1.0, %v624_v6  ;;  %v666_v38 = vadd.f32 2.0, %v624_v6  ;;  %v144_v43 = vadd.f32 3.0, %v624_v6 }
  0x62   :  { %v146_v46 = vadd.f32 4.0, %v624_v6  ;;  %v147_v47 = vadd.f32 5.0, %v624_v6  ;;  %v149_v0 = vadd.f32 6.0, %v624_v6  ;;  %v151_v5 = vadd.f32 7.0, %v624_v6 }
  0x63   :  { %429 = vrcp.f32 %v631_v11  ;;  %v420_v22 = vpop.eup %419  ;;  %v675_v59 = vmul.f32 %v662_v34, %v624_v6 }
  0x64   :  { %431 = vlog2.f32 %v186_v14  ;;  %v422_v29 = vpop.eup %421  ;;  %v205_v31 = vmul.f32 %v420_v22, %v420_v22  ;;  %v148_v10 = vmul.f32 %v147_v47, %v146_v46  ;;  %v262_v14 = vadd.f32 %v586_v55, %v184_v7 }
  0x65   :  { %433 = vlog2.f32 %v199_v16  ;;  %v424_v33 = vpop.eup %423  ;;  %v206_v35 = vmul.f32 %v422_v29, %v422_v29  ;;  %v695_v55 = vmul.f32 %v257_v32, %v255_v28  ;;  %v263_v7 = vmul.f32 %v261_v13, %v574_v50 }
  0x66   :  { %435 = vlog2.f32 %v200_v18  ;;  %v426_v37 = vpop.eup %425  ;;  %v207_v39 = vmul.f32 0.0007936508, %v205_v31  ;;  %v220_v40 = vmul.f32 0.6931472, %v424_v33  ;;  %v150_v50 = vmul.f32 %v149_v0, %v148_v10 }
  0x67   :  { %437 = vrcp.f32 %v595_v58  ;;  %v208_v44 = vmul.f32 0.0007936508, %v206_v35  ;;  %v222_v45 = vmul.f32 0.6931472, %v426_v37  ;;  %v307_v37 = vadd.f32 %v146_v46, %v144_v43 }
  0x68   :  { %439 = vrcp.f32 %v599_v60  ;;  %v209_v51 = vadd.f32 -0.0027777778, %v207_v39  ;;  %v223_v48 = vmul.f32 %v401_v24, %v220_v40  ;;  %v303_v24 = vmul.f32 %v146_v46, %v144_v43 }
  0x69   :  { %441 = vlog2.f32 %v631_v11  ;;  %v210_v62 = vadd.f32 -0.0027777778, %v208_v44  ;;  %v224_v63 = vmul.f32 %v402_v25, %v222_v45  ;;  %v265_v46 = vadd.f32 %v263_v7, %v643_v19 }
  0x6a   :  { %v211_v1 = vmul.f32 %v209_v51, %v205_v31  ;;  %v225_v4 = vsub.f32 %v223_v48, %v580_v53  ;;  %443 = vlog2.f32 %v595_v58  ;;  %v428_v16 = vpop.eup %427  ;;  %v143_v53 = vmul.f32 %v666_v38, %v675_v59 }
  0x6b   :  { %v212_v8 = vmul.f32 %v210_v62, %v206_v35  ;;  %v226_v9 = vsub.f32 %v224_v63, %v583_v54  ;;  %445 = vlog2.f32 %v599_v60  ;;  %v271_v58 = vmul.f32 %v643_v19, %v604_v61 }
  0x6c   :  { %v213_v12 = vadd.f32 0.083333336, %v211_v1  ;;  %v227_v60 = vadd.f32 0.9189385, %v225_v4  ;;  %447 = vrcp.f32 %v147_v47  ;;  %v264_v61 = vmul.f32 %v262_v14, %v592_v57 }
  0x6d   :  { %v214_v18 = vadd.f32 0.083333336, %v212_v8  ;;  %v228_v31 = vadd.f32 0.9189385, %v226_v9  ;;  %449 = vlog2.f32 %v147_v47  ;;  %v232_v40 = vmul.f32 0.6931472, %v428_v16 }
  0x6e   :  { %v215_v54 = vmul.f32 %v420_v22, %v213_v12  ;;  %v312_v44 = vmul.f32 %v303_v24, %v143_v53  ;;  %451 = vrcp.f32 %v271_v58  ;;  %v145_v48 = vmul.f32 %v144_v43, %v143_v53 }
  0x6f   :  { %v216_v35 = vmul.f32 %v422_v29, %v214_v18  ;;  %v399_v29 = vadd.f32 -0.5, %v631_v11  ;;  %v260_v62 = vmul.f32 %v258_v36, %v256_v52  ;;  %453 = vrcp.f32 %v272_v3 }
  0x70   :  { %v691_v25 = vpop.eup %429  ;;  %v229_v28 = vadd.f32 %v227_v60, %v215_v54  ;;  %v266_v47 = vadd.f32 %v264_v61, %v656_v26  ;;  %v308_v1 = vmul.f32 %v307_v37, %v666_v38  ;;  %455 = vrcp.f32 %v312_v44 }
  0x71   :  { %v432_v33 = vpop.eup %431  ;;  %v155_v39 = vmul.f32 %v691_v25, %v691_v25  ;;  %v230_v32 = vadd.f32 %v228_v31, %v216_v35  ;;  %v152_v36 = vmul.f32 %v151_v5, %v150_v50  ;;  %457 = vlog2.f32 %v145_v48 }
  0x72   :  { %v434_v22 = vpop.eup %433  ;;  %v234_v51 = vmul.f32 0.6931472, %v432_v33  ;;  %v235_v13 = vsub.f32 %v229_v28, %v232_v40  ;;  %v305_v19 = vadd.f32 %v662_v34, %v624_v6  ;;  %v267_v53 = vmul.f32 %v265_v46, %v571_v49 }
  0x73   :  { %v436_v45 = vpop.eup %435  ;;  %v156_v4 = vmul.f32 0.0007936508, %v155_v39  ;;  %v238_v8 = vmul.f32 0.6931472, %v434_v22  ;;  %v268_v18 = vmul.f32 %v266_v47, %v589_v56  ;;  %v304_v54 = vmul.f32 %v303_v24, %v666_v38 }
  0x74   :  { %v438_v2 = vpop.eup %437  ;;  %v236_v14 = vsub.f32 %v230_v32, %v234_v51  ;;  %v240_v16 = vmul.f32 0.6931472, %v436_v45  ;;  %v309_v35 = vadd.f32 %v308_v1, %v303_v24  ;;  %v120_v49 = vadd.f32 %v119_v23, %v635_v15 }
  0x75   :  { %v440_v57 = vpop.eup %439  ;;  %v279_v63 = vmul.f32 %v438_v2, %v438_v2  ;;  %v157_v60 = vadd.f32 -0.0027777778, %v156_v4  ;;  %v241_v52 = vsub.f32 %v235_v13, %v238_v8  ;;  %v295_v7 = vmul.f32 0.5, %v438_v2 }
  0x76   :  { %v280_v9 = vmul.f32 %v440_v57, %v440_v57  ;;  %v442_v12 = vpop.eup %441  ;;  %v242_v3 = vsub.f32 %v236_v14, %v240_v16  ;;  %v296_v34 = vmul.f32 0.5, %v440_v57  ;;  %459 = vlog2.f32 %v152_v36 }
  0x77   :  { %v281_v43 = vmul.f32 0.003968254, %v279_v63  ;;  %v444_v0 = vpop.eup %443  ;;  %v163_v31 = vmul.f32 0.6931472, %v442_v12  ;;  %v269_v24 = vadd.f32 %v267_v53, %v695_v55  ;;  %v306_v28 = vmul.f32 %v305_v19, %v304_v54 }
  0x78   :  { %v282_v10 = vmul.f32 0.003968254, %v280_v9  ;;  %v446_v26 = vpop.eup %445  ;;  %v292_v22 = vmul.f32 0.6931472, %v444_v0  ;;  %v158_v32 = vmul.f32 %v157_v60, %v155_v39  ;;  %v243_v51 = vadd.f32 %v242_v3, %v241_v52 }
  0x79   :  { %v283_v58 = vsub.f32 0.008333334, %v281_v43  ;;  %v448_v61 = vpop.eup %447  ;;  %v294_v6 = vmul.f32 0.6931472, %v446_v26  ;;  %v164_v44 = vmul.f32 %v399_v29, %v163_v31  ;;  %v310_v2 = vmul.f32 %v309_v35, %v675_v59 }
  0x7a   :  { %v284_v33 = vsub.f32 0.008333334, %v282_v10  ;;  %v316_v38 = vmul.f32 %v448_v61, %v448_v61  ;;  %v450_v40 = vpop.eup %449  ;;  %v270_v57 = vadd.f32 %v268_v18, %v260_v62  ;;  %v297_v46 = vsub.f32 %v292_v22, %v295_v7 }
  0x7b   :  { %v285_v5 = vmul.f32 %v283_v58, %v279_v63  ;;  %v452_v50 = vpop.eup %451  ;;  %v298_v47 = vsub.f32 %v294_v6, %v296_v34  ;;  %v324_v1 = vmul.f32 0.5, %v448_v61  ;;  %v323_v12 = vmul.f32 0.6931472, %v450_v40 }
  0x7c   :  { %v286_v37 = vmul.f32 %v284_v33, %v280_v9  ;;  %v317_v48 = vmul.f32 0.003968254, %v316_v38  ;;  %v454_v15 = vpop.eup %453  ;;  %v121_v29 = vrot.slane %v120_v49, 2  ;;  %461 = vrcp.f32 %v638_v17 }
  0x7d   :  { %v287_v56 = vsub.f32 0.083333336, %v285_v5  ;;  %v165_v55 = vsub.f32 %v164_v44, %v631_v11  ;;  %v456_v39 = vpop.eup %455  ;;  %v159_v13 = vadd.f32 0.083333336, %v158_v32  ;;  %v244_v14 = vrot.slane %v243_v51, 4 }
  0x7e   :  { %v288_v45 = vsub.f32 0.083333336, %v286_v37  ;;  %v318_v8 = vsub.f32 0.008333334, %v317_v48  ;;  %v311_v59 = vadd.f32 %v310_v2, %v306_v28  ;;  %v274_v43 = vmul.f32 %v452_v50, %v269_v24  ;;  %v458_v36 = vpop.eup %457 }
  0x7f   :  { %v289_v23 = vmul.f32 %v287_v56, %v279_v63  ;;  %v276_v62 = vmul.f32 %v454_v15, %v270_v57  ;;  %v350_v0 = vadd.f32 %v650_v21, %v647_v20  ;;  %v325_v19 = vsub.f32 %v323_v12, %v324_v1 }
  0x80   :  { %v290_v4 = vmul.f32 %v288_v45, %v280_v9  ;;  %v319_v16 = vmul.f32 %v318_v8, %v316_v38  ;;  %v122_v26 = vadd.f32 %v121_v29, %v120_v49  ;;  %v166_v53 = vadd.f32 0.9189385, %v165_v55 }
  0x81   :  { %v299_v63 = vsub.f32 %v297_v46, %v289_v23  ;;  %v160_v17 = vmul.f32 %v691_v25, %v159_v13  ;;  %v245_v11 = vadd.f32 %v244_v14, %v243_v51  ;;  %v314_v18 = vmul.f32 %v456_v39, %v311_v59 }
  0x82   :  { %v300_v9 = vsub.f32 %v298_v47, %v290_v4  ;;  %v320_v10 = vsub.f32 0.083333336, %v319_v16  ;;  %v351_v33 = vrot.slane %v350_v0, 4  ;;  %v123_v52 = vrot.slane %v122_v26, 1 }
  0x83   :  { %v301_v54 = vsub.f32 %v299_v63, %v274_v43  ;;  %v460_v35 = vpop.eup %459  ;;  %v403_v20 = vadd.f32 -1.0, %v561_v41  ;;  %v404_v21 = vadd.f32 -1.0, %v564_v42  ;;  %v167_v3 = vadd.f32 %v166_v53, %v160_v17  ;;  %v373_v53 = vld [vmem:[#allocation5] sm:$0x1] }
  0x84   :  { %v321_v58 = vmul.f32 %v320_v10, %v316_v38  ;;  %v302_v60 = vsub.f32 %v300_v9, %v276_v62  ;;  %v169_v5 = vmul.f32 0.6931472, %v458_v36  ;;  %v246_v7 = vrot.slane %v245_v11, 2 }
  0x85   :  { %v352_v25 = vadd.f32 %v351_v33, %v350_v0  ;;  %v124_v6 = vadd.f32 %v123_v52, %v122_v26  ;;  %v172_v34 = vmul.f32 0.6931472, %v460_v35  ;;  %v344_v4 = vadd.f32 1.0, %v551_v30 }
  0x86   :  { %v326_v31 = vsub.f32 %v325_v19, %v321_v58  ;;  %v170_v56 = vsub.f32 %v167_v3, %v169_v5  ;;  %v247_v38 = vadd.f32 %v246_v7, %v245_v11 }
  0x87   :  { %v353_v45 = vrot.slane %v352_v25, 2 }
  0x88   :  { %v327_v61 = vsub.f32 %v326_v31, %v314_v18  ;;  %v173_v41 = vsub.f32 %v170_v56, %v172_v34  ;;  %v248_v32 = vrot.slane %v247_v38, 1 }
  0x89   :  { %v462_v49 = vpop.eup %461  ;;  %v354_v2 = vadd.f32 %v353_v45, %v352_v25 }
  0x8a   :  { %v328_v37 = vsub.f32 %v301_v54, %v327_v61  ;;  %v329_v22 = vsub.f32 %v302_v60, %v327_v61  ;;  %v126_v28 = vmul.f32 %v462_v49, %v124_v6  ;;  %v400_v50 = vadd.f32 -27.899271, %v173_v41 }
  0x8b   :  { %v249_v57 = vadd.f32 %v248_v32, %v247_v38  ;;  %v355_v1 = vrot.slane %v354_v2, 1 }
  0x8c   :  { %v330_v40 = vmul.f32 %v403_v20, %v328_v37  ;;  %v331_v44 = vmul.f32 %v404_v21, %v329_v22  ;;  %v127_v48 = vadd.f32 1e-05, %v126_v28 }
  0x8d   :  { %v250_v15 = vsub.f32 %v400_v50, %v249_v57  ;;  %v356_v12 = vadd.f32 %v355_v1, %v354_v2 }
  0x8e   :  { %v332_v24 = vadd.f32 %v331_v44, %v330_v40  ;;  %463 = vlog2.f32 %v127_v48 }
  0x8f   :  { %465 = vlog2.f32 %v344_v4 }
  0x90   :  { %v333_v42 = vrot.slane %v332_v24, 4  ;;  %467 = vlog2.f32 %v356_v12 }
  0x92   :  { %v334_v51 = vadd.f32 %v333_v42, %v332_v24 }
  0x94   :  { %v335_v46 = vrot.slane %v334_v51, 2 }
  0x96   :  { %v336_v47 = vadd.f32 %v335_v46, %v334_v51 }
  0x98   :  { %v337_v23 = vrot.slane %v336_v47, 1 }
  0x9a   :  { %v338_v8 = vadd.f32 %v337_v23, %v336_v47 }
  0x9b   :  { %v464_v39 = vpop.eup %463 }
  0x9c   :  { %v339_v29 = vadd.f32 %v338_v8, %v250_v15  ;;  %v129_v13 = vmul.f32 0.6931472, %v464_v39  ;;  %v466_v14 = vpop.eup %465 }
  0x9d   :  { %v468_v59 = vpop.eup %467  ;;  %v346_v43 = vmul.f32 0.6931472, %v466_v14 }
  0x9e   :  { %v340_v55 = vadd.f32 1.0, %v339_v29  ;;  %v130_v16 = vsub.f32 0.0, %v129_v13  ;;  %v358_v36 = vmul.f32 0.6931472, %v468_v59 }
  0xa0   :  { %469 = vrcp.f32 %v340_v55  ;;  %v360_v9 = vmul.f32 0.5, %v130_v16  ;;  %v359_v10 = vsub.f32 0.0, %v358_v36 }
  0xad   :  { %v470_v62 = vpop.eup %469 }
  0xae   :  { %v343_v0 = vsub.f32 1.0, %v470_v62 }
  0xb0   :  { %v347_v63 = vmul.f32 %v346_v43, %v343_v0 }
  0xb2   :  { %v361_v30 = vmul.f32 0.4, %v347_v63 }
  0xb4   :  { %v362_v19 = vadd.f32 %v361_v30, %v360_v9 }
  0xb6   :  { %v363_v26 = vadd.f32 %v362_v19, %v359_v10 }
  0xb8   :  { %v374_v17 = vmul.f32 %v546_v27, %v363_v26 }
  0xba   :  { %v375_v11 = vadd.f32 %v374_v17, %v373_v53 }
  0xbc   :  { %376 = vst [vmem:[#allocation5] sm:$0x1] %v375_v11 }
  0xbd   :  { %502 = shalt.err (!%p499_p9)
}
  0xbe   :  { %386 = dma.vmem_to_hbm [thread:$0]  %s384_s21, 128, %s732_s3, [#allocation4]  }
  0xbf   :  { %513 = dma.done.wait [#allocation4], 128  }
  0xc0   :  { %514 = vsyncadd [#allocation4], 4294967168 }
  0xc1   :  { %390 = vsyncpa [#allocation3], 1 }
  0xc2   :  { %391 = vsyncpa [#allocation4], 1 }

</bundles_post_ra>
